<compile_context>
chip_gen: v7x
topology: tpu7x:2x2x1
jax: 0.10.0
libtpu: 0.0.40
codegen_flags: <defaults>
</compile_context>

<pallas_src>
import functools

import jax
import jax.numpy as jnp
from jax.experimental import pallas as pl
from jax.experimental.pallas import tpu as pltpu


def _lip2d_kernel(x_ref, w_ref, b_ref, o_ref, acc_ref, *,
                  hw_total, n_hw, n_hw_inner, n_split, b_tile,
                  needs_mask, has_oob_tiles, cast_bf16):
    # x_ref:   (b_tile, C, t_hw)   channels on sublanes, spatial on lanes
    # w_ref:   (C, C)              1x1-conv weight, (out, in) (bf16 if cast_bf16)
    # b_ref:   (C, 1)              1x1-conv bias
    # o_ref:   (1, b_tile, C, 1)   f32 un-normalised partial sums for this split
    # acc_ref: (b_tile, C, 1) f32  running weighted-sum over spatial tiles
    h = pl.program_id(2)
    t_hw = x_ref.shape[2]

    @pl.when(h == 0)
    def _():
        acc_ref[...] = jnp.zeros_like(acc_ref)

    # Global spatial-tile index (split axis folded in).
    if n_split == 1:
        g = h
    else:
        g = pl.program_id(0) * n_hw_inner + h

    w = w_ref[...]
    bias = b_ref[...].astype(jnp.float32)

    def accumulate(masked):
        for bi in range(b_tile):                      # static unroll, b_tile <= 8
            xb = x_ref[bi]                            # (C, t_hw), native dtype
            xm = xb.astype(jnp.bfloat16) if cast_bf16 else xb
            # 1x1 conv == (C_out, C_in) @ (C_in, t_hw) on the MXU, f32 accumulation.
            logits = jnp.dot(w, xm, preferred_element_type=jnp.float32) + bias
            # sigmoid via a single transcendental (one EUP op instead of exp+recip).
            gate = 0.5 * jnp.tanh(0.5 * logits) + 0.5
            weighted = xb.astype(jnp.float32) * gate  # f32 (C, t_hw)
            if masked:
                # Only the last real spatial tile pays this: zero the columns that
                # run past HW before reducing (pad garbage cannot reach the acc).
                col = jax.lax.broadcasted_iota(jnp.int32, weighted.shape, 1) + g * t_hw
                weighted = jnp.where(col < hw_total, weighted, 0.0)
            acc_ref[bi] += jnp.sum(weighted, axis=1, keepdims=True)   # (C, 1)

    if not needs_mask:
        if has_oob_tiles:
            # Split axis padded the tile count: skip duplicated (clamped) tiles.
            @pl.when(g < n_hw)
            def _():
                accumulate(False)
        else:
            accumulate(False)
    else:
        # Fast unmasked path for every tile but the last real one.
        @pl.when(g < n_hw - 1)
        def _():
            accumulate(False)

        @pl.when(g == n_hw - 1)
        def _():
            accumulate(True)

    @pl.when(h == pl.num_programs(2) - 1)
    def _():
        o_ref[0] = acc_ref[...]


def lip2d_forward(x, conv_w, conv_b, *, target_tile_bytes=None, vmem_limit_bytes=None):
    """x: (B, C, H, W) NCHW; conv_w: (C, C, 1, 1); conv_b: (C,). Returns (B, C, 1, 1)."""
    B, C, H, W = x.shape
    HW = H * W
    dtype_bytes = jnp.dtype(x.dtype).itemsize

    # Derive tile / VMEM budgets from the chip (v7x: 64 MiB VMEM; v5e/v6e: 128 MiB).
    if target_tile_bytes is None or vmem_limit_bytes is None:
        try:
            vmem_cap = int(pltpu.get_tpu_info().vmem_capacity_bytes)
        except Exception:
            vmem_cap = 64 << 20  # conservative fallback
        if target_tile_bytes is None:
            target_tile_bytes = (2 << 20) if vmem_cap <= (64 << 20) else (4 << 20)
        if vmem_limit_bytes is None:
            vmem_limit_bytes = min(vmem_cap // 2, 48 << 20)

    x_flat = x.reshape(B, C, HW)   # free reshape (contiguous), no transpose over HBM
    w2 = conv_w.reshape(C, C)      # (out, in)
    b2 = conv_b.reshape(C, 1)

    # bf16 MXU operands (f32 accumulate) once the conv could become MXU-bound;
    # for small C keep exact f32 (the gate is precision-tolerant anyway).
    cast_bf16 = bool(x.dtype == jnp.float32 and C >= 128)
    if cast_bf16:
        w2 = w2.astype(jnp.bfloat16)

    per_image_bytes = C * HW * dtype_bytes
    if per_image_bytes <= target_tile_bytes:
        # Small feature map: whole HW per block, block several images per grid step.
        t_hw = HW
        want = max(1, target_tile_bytes // max(per_image_bytes, 1))
        limit = int(min(B, 8, want))
        b_tile = max(d for d in range(1, limit + 1) if B % d == 0)
    else:
        # Large feature map: one image per step, tile HW (lane axis, multiple of 128).
        b_tile = 1
        t_hw = (target_tile_bytes // (C * dtype_bytes)) // 128 * 128
        t_hw = int(max(128, min(t_hw, 8192)))

    n_hw = pl.cdiv(HW, t_hw)
    needs_mask = (HW % t_hw) != 0
    n_b = B // b_tile

    # v7x has 2 TensorCores: if batch alone can't give a >=2-way parallel grid, split
    # the spatial tiles across an outer parallel axis of size 2 (partial sums are
    # combined below). No-op on v5e/v6e (single TC) and whenever B >= 2.
    n_split = 2 if (B == 1 and n_hw >= 2) else 1
    n_hw_inner = pl.cdiv(n_hw, n_split)
    has_oob_tiles = (n_split * n_hw_inner) > n_hw

    if n_split == 1:
        x_map = lambda s, b, h: (b, 0, h)
    else:
        last_blk = n_hw - 1
        # Clamp so DMAs never address past the array; duplicated tiles are skipped
        # inside the kernel via pl.when.
        x_map = lambda s, b, h: (b, 0, jnp.minimum(s * n_hw_inner + h, last_blk))

    kernel = functools.partial(
        _lip2d_kernel,
        hw_total=HW, n_hw=n_hw, n_hw_inner=n_hw_inner, n_split=n_split,
        b_tile=b_tile, needs_mask=needs_mask, has_oob_tiles=has_oob_tiles,
        cast_bf16=cast_bf16)

    partial_sums = pl.pallas_call(
        kernel,
        out_shape=jax.ShapeDtypeStruct((n_split, B, C, 1), jnp.float32),
        grid_spec=pltpu.PrefetchScalarGridSpec(
            num_scalar_prefetch=0,
            grid=(n_split, n_b, n_hw_inner),
            in_specs=[
                pl.BlockSpec((b_tile, C, t_hw), x_map),
                pl.BlockSpec((C, C), lambda s, b, h: (0, 0)),
                pl.BlockSpec((C, 1), lambda s, b, h: (0, 0)),
            ],
            out_specs=pl.BlockSpec((1, b_tile, C, 1), lambda s, b, h: (s, b, 0, 0)),
            scratch_shapes=[pltpu.VMEM((b_tile, C, 1), jnp.float32)],
        ),
        compiler_params=pltpu.CompilerParams(
            dimension_semantics=("parallel", "parallel", "arbitrary"),
            vmem_limit_bytes=int(vmem_limit_bytes),
        ),
    )(x_flat, w2, b2)

    pooled = jnp.sum(partial_sums, axis=0) * (1.0 / HW)   # (B, C, 1) f32
    return pooled.reshape(B, C, 1, 1).astype(x.dtype)


def lip2d_reference(x, conv_w, conv_b):
    # Pure-JAX reference of the PyTorch forward for correctness checking.
    B, C, H, W = x.shape
    w2 = conv_w.reshape(C, C)                                   # (out, in)
    logits = jnp.einsum('bihw,oi->bohw', x, w2) + conv_b[None, :, None, None]
    gate = jax.nn.sigmoid(logits)
    return jnp.mean(x * gate, axis=(2, 3), keepdims=True)


def _make_case(key, B, C, H, W):
    kx, kw, kb = jax.random.split(key, 3)
    x = jax.random.normal(kx, (B, C, H, W), dtype=jnp.float32)
    scale = 1.0 / (C ** 0.5)
    conv_w = jax.random.normal(kw, (C, C, 1, 1), dtype=jnp.float32) * scale
    conv_b = jax.random.normal(kb, (C,), dtype=jnp.float32) * 0.1
    return x, conv_w, conv_b


if __name__ == "__main__":
    key = jax.random.PRNGKey(0)
    k1, k2, k3 = jax.random.split(key, 3)

    # Case 1 (primary): small feature map -> batch-blocked path (b_tile=2), exact f32.
    x, w, b = _make_case(k1, B=2, C=4, H=16, W=16)
    out = jax.block_until_ready(lip2d_forward(x, w, b))
    ref = lip2d_reference(x, w, b)
    assert out.shape == (2, 4, 1, 1)
    assert jnp.allclose(out, ref, atol=1e-5, rtol=1e-5), "case1 mismatch vs reference"

    # Case 2: forced tiny tile -> HW tiling + masked tail tile + 2-way split (B=1).
    x, w, b = _make_case(k2, B=1, C=4, H=15, W=20)
    out = jax.block_until_ready(lip2d_forward(x, w, b, target_tile_bytes=4096))
    ref = lip2d_reference(x, w, b)
    assert out.shape == (1, 4, 1, 1)
    assert jnp.allclose(out, ref, atol=1e-5, rtol=1e-5), "case2 mismatch vs reference"

    # Case 3: C >= 128 -> bf16 MXU operands for the 1x1 conv (loosened tolerance).
    x, w, b = _make_case(k3, B=1, C=128, H=8, W=8)
    out = jax.block_until_ready(lip2d_forward(x, w, b))
    ref = lip2d_reference(x, w, b)
    assert out.shape == (1, 128, 1, 1)
    assert jnp.allclose(out, ref, atol=1e-2, rtol=1e-2), "case3 mismatch vs reference"

    print("KERNEL_OK")
</pallas_src>

<mosaic_0001>
module attributes {stable_mosaic.version = 11 : i64} {
  func.func @_lip2d_kernel(%arg0: i32, %arg1: i32, %arg2: i32, %arg3: memref<2x4x256xf32, #tpu.memory_space<vmem>>, %arg4: memref<4x4xf32, #tpu.memory_space<vmem>>, %arg5: memref<4x1xf32, #tpu.memory_space<vmem>>, %arg6: memref<1x2x4x1xf32, #tpu.memory_space<vmem>>, %arg7: memref<2x4x1xf32, #tpu.memory_space<vmem>>) attributes {dimension_semantics = [#tpu.dimension_semantics<parallel>, #tpu.dimension_semantics<parallel>, #tpu.dimension_semantics<arbitrary>], iteration_bounds = array<i64: 1, 1, 1>, scalar_prefetch = 0 : i64, scratch_operands = 1 : i64, tpu.core_type = #tpu.core_type<tc>, window_params = [{transform_indices = @transform_0, window_bounds = array<i64: 2, 4, 256>}, {pipeline_mode = #tpu.pipeline_mode<synchronous>, transform_indices = @transform_1, window_bounds = array<i64: 4, 4>}, {pipeline_mode = #tpu.pipeline_mode<synchronous>, transform_indices = @transform_2, window_bounds = array<i64: 4, 1>}, {transform_indices = @transform_3, window_bounds = array<i64: 1, 2, 4, 1>}]} {
    %c0_i32 = arith.constant 0 : i32
    %0 = arith.cmpi eq, %arg2, %c0_i32 : i32
    %1 = arith.extui %0 : i1 to i32
    %c0_i32_0 = arith.constant 0 : i32
    %2 = arith.cmpi ne, %1, %c0_i32_0 : i32
    scf.if %2 {
      %cst_32 = arith.constant 0.000000e+00 : f32
      %50 = vector.broadcast %cst_32 : f32 to vector<2x4x1xf32>
      %c0_33 = arith.constant 0 : index
      %c0_34 = arith.constant 0 : index
      %c0_35 = arith.constant 0 : index
      %51 = vector.load %arg7[%c0_33, %c0_34, %c0_35] : memref<2x4x1xf32, #tpu.memory_space<vmem>>, vector<2x4x1xf32>
      tpu.vector_store %arg7[%c0_33, %c0_34, %c0_35], %50 {strides = array<i32>} : memref<2x4x1xf32, #tpu.memory_space<vmem>>, vector<2x4x1xf32>,
    } else {
    }
    %c0 = arith.constant 0 : index
    %c0_1 = arith.constant 0 : index
    %3 = vector.load %arg4[%c0, %c0_1] : memref<4x4xf32, #tpu.memory_space<vmem>>, vector<4x4xf32>
    %c0_2 = arith.constant 0 : index
    %c0_3 = arith.constant 0 : index
    %4 = vector.load %arg5[%c0_2, %c0_3] : memref<4x1xf32, #tpu.memory_space<vmem>>, vector<4x1xf32>
    %c0_4 = arith.constant 0 : index
    %c0_5 = arith.constant 0 : index
    %c0_6 = arith.constant 0 : index
    %5 = vector.load %arg3[%c0_4, %c0_5, %c0_6] : memref<2x4x256xf32, #tpu.memory_space<vmem>>, vector<1x4x256xf32>
    %6 = vector.shape_cast %5 : vector<1x4x256xf32> to vector<4x256xf32>
    %cst = arith.constant dense<0.000000e+00> : vector<4x256xf32>
    %7 = tpu.matmul %3, %6, %cst {dimension_numbers = #tpu.dot_dimension_numbers<[1], [0], [0], [1], [0, 0, 1, 1], [], []>} : vector<4x4xf32>, vector<4x256xf32>, vector<4x256xf32> -> vector<4x256xf32>
    %8 = vector.broadcast %4 : vector<4x1xf32> to vector<4x256xf32>
    %9 = arith.addf %7, %8 : vector<4x256xf32>
    %cst_7 = arith.constant 5.000000e-01 : f32
    %10 = vector.broadcast %cst_7 : f32 to vector<4x256xf32>
    %11 = arith.mulf %10, %9 : vector<4x256xf32>
    %12 = math.tanh %11 : vector<4x256xf32>
    %cst_8 = arith.constant 5.000000e-01 : f32
    %13 = vector.broadcast %cst_8 : f32 to vector<4x256xf32>
    %14 = arith.mulf %13, %12 : vector<4x256xf32>
    %cst_9 = arith.constant 5.000000e-01 : f32
    %15 = vector.broadcast %cst_9 : f32 to vector<4x256xf32>
    %16 = arith.addf %14, %15 : vector<4x256xf32>
    %17 = arith.mulf %6, %16 : vector<4x256xf32>
    %c0_10 = arith.constant 0 : index
    %c0_11 = arith.constant 0 : index
    %c0_12 = arith.constant 0 : index
    %18 = vector.load %arg7[%c0_10, %c0_11, %c0_12] : memref<2x4x1xf32, #tpu.memory_space<vmem>>, vector<1x4x1xf32>
    %19 = vector.shape_cast %18 : vector<1x4x1xf32> to vector<4x1xf32>
    %cst_13 = arith.constant dense<0.000000e+00> : vector<4xf32>
    %20 = vector.multi_reduction <add>, %17, %cst_13 [1] : vector<4x256xf32> to vector<4xf32>
    %21 = vector.shape_cast %20 : vector<4xf32> to vector<4x1xf32>
    %22 = arith.addf %19, %21 : vector<4x1xf32>
    %c0_14 = arith.constant 0 : index
    %c0_15 = arith.constant 0 : index
    %c0_16 = arith.constant 0 : index
    %23 = vector.load %arg7[%c0_14, %c0_15, %c0_16] : memref<2x4x1xf32, #tpu.memory_space<vmem>>, vector<1x4x1xf32>
    %24 = vector.shape_cast %23 : vector<1x4x1xf32> to vector<4x1xf32>
    %25 = vector.shape_cast %22 : vector<4x1xf32> to vector<1x4x1xf32>
    tpu.vector_store %arg7[%c0_14, %c0_15, %c0_16], %25 {strides = array<i32>} : memref<2x4x1xf32, #tpu.memory_space<vmem>>, vector<1x4x1xf32>,
    %c1 = arith.constant 1 : index
    %c0_17 = arith.constant 0 : index
    %c0_18 = arith.constant 0 : index
    %26 = vector.load %arg3[%c1, %c0_17, %c0_18] : memref<2x4x256xf32, #tpu.memory_space<vmem>>, vector<1x4x256xf32>
    %27 = vector.shape_cast %26 : vector<1x4x256xf32> to vector<4x256xf32>
    %cst_19 = arith.constant dense<0.000000e+00> : vector<4x256xf32>
    %28 = tpu.matmul %3, %27, %cst_19 {dimension_numbers = #tpu.dot_dimension_numbers<[1], [0], [0], [1], [0, 0, 1, 1], [], []>} : vector<4x4xf32>, vector<4x256xf32>, vector<4x256xf32> -> vector<4x256xf32>
    %29 = vector.broadcast %4 : vector<4x1xf32> to vector<4x256xf32>
    %30 = arith.addf %28, %29 : vector<4x256xf32>
    %cst_20 = arith.constant 5.000000e-01 : f32
    %31 = vector.broadcast %cst_20 : f32 to vector<4x256xf32>
    %32 = arith.mulf %31, %30 : vector<4x256xf32>
    %33 = math.tanh %32 : vector<4x256xf32>
    %cst_21 = arith.constant 5.000000e-01 : f32
    %34 = vector.broadcast %cst_21 : f32 to vector<4x256xf32>
    %35 = arith.mulf %34, %33 : vector<4x256xf32>
    %cst_22 = arith.constant 5.000000e-01 : f32
    %36 = vector.broadcast %cst_22 : f32 to vector<4x256xf32>
    %37 = arith.addf %35, %36 : vector<4x256xf32>
    %38 = arith.mulf %27, %37 : vector<4x256xf32>
    %c1_23 = arith.constant 1 : index
    %c0_24 = arith.constant 0 : index
    %c0_25 = arith.constant 0 : index
    %39 = vector.load %arg7[%c1_23, %c0_24, %c0_25] : memref<2x4x1xf32, #tpu.memory_space<vmem>>, vector<1x4x1xf32>
    %40 = vector.shape_cast %39 : vector<1x4x1xf32> to vector<4x1xf32>
    %cst_26 = arith.constant dense<0.000000e+00> : vector<4xf32>
    %41 = vector.multi_reduction <add>, %38, %cst_26 [1] : vector<4x256xf32> to vector<4xf32>
    %42 = vector.shape_cast %41 : vector<4xf32> to vector<4x1xf32>
    %43 = arith.addf %40, %42 : vector<4x1xf32>
    %c1_27 = arith.constant 1 : index
    %c0_28 = arith.constant 0 : index
    %c0_29 = arith.constant 0 : index
    %44 = vector.load %arg7[%c1_27, %c0_28, %c0_29] : memref<2x4x1xf32, #tpu.memory_space<vmem>>, vector<1x4x1xf32>
    %45 = vector.shape_cast %44 : vector<1x4x1xf32> to vector<4x1xf32>
    %46 = vector.shape_cast %43 : vector<4x1xf32> to vector<1x4x1xf32>
    tpu.vector_store %arg7[%c1_27, %c0_28, %c0_29], %46 {strides = array<i32>} : memref<2x4x1xf32, #tpu.memory_space<vmem>>, vector<1x4x1xf32>,
    %c0_i32_30 = arith.constant 0 : i32
    %47 = arith.cmpi eq, %arg2, %c0_i32_30 : i32
    %48 = arith.extui %47 : i1 to i32
    %c0_i32_31 = arith.constant 0 : i32
    %49 = arith.cmpi ne, %48, %c0_i32_31 : i32
    scf.if %49 {
      %c0_32 = arith.constant 0 : index
      %c0_33 = arith.constant 0 : index
      %c0_34 = arith.constant 0 : index
      %50 = vector.load %arg7[%c0_32, %c0_33, %c0_34] : memref<2x4x1xf32, #tpu.memory_space<vmem>>, vector<2x4x1xf32>
      %c0_35 = arith.constant 0 : index
      %c0_36 = arith.constant 0 : index
      %c0_37 = arith.constant 0 : index
      %c0_38 = arith.constant 0 : index
      %51 = vector.load %arg6[%c0_35, %c0_36, %c0_37, %c0_38] : memref<1x2x4x1xf32, #tpu.memory_space<vmem>>, vector<1x2x4x1xf32>
      %52 = vector.shape_cast %51 : vector<1x2x4x1xf32> to vector<2x4x1xf32>
      %53 = vector.shape_cast %50 : vector<2x4x1xf32> to vector<1x2x4x1xf32>
      tpu.vector_store %arg6[%c0_35, %c0_36, %c0_37, %c0_38], %53 {strides = array<i32>} : memref<1x2x4x1xf32, #tpu.memory_space<vmem>>, vector<1x2x4x1xf32>,
    } else {
    }
    return
  }
  func.func @transform_0(%arg0: i32, %arg1: i32, %arg2: i32) -> (i32, i32, i32) {
    %c0_i32 = arith.constant 0 : i32
    %c0_i32_0 = arith.constant 0 : i32
    return %arg1, %c0_i32, %arg2 : i32, i32, i32
  }
  func.func @transform_1(%arg0: i32, %arg1: i32, %arg2: i32) -> (i32, i32) {
    %c0_i32 = arith.constant 0 : i32
    %c0_i32_0 = arith.constant 0 : i32
    %c0_i32_1 = arith.constant 0 : i32
    return %c0_i32, %c0_i32_0 : i32, i32
  }
  func.func @transform_2(%arg0: i32, %arg1: i32, %arg2: i32) -> (i32, i32) {
    %c0_i32 = arith.constant 0 : i32
    %c0_i32_0 = arith.constant 0 : i32
    %c0_i32_1 = arith.constant 0 : i32
    return %c0_i32, %c0_i32_0 : i32, i32
  }
  func.func @transform_3(%arg0: i32, %arg1: i32, %arg2: i32) -> (i32, i32, i32, i32) {
    %c0_i32 = arith.constant 0 : i32
    %c0_i32_0 = arith.constant 0 : i32
    %c0_i32_1 = arith.constant 0 : i32
    return %arg0, %arg1, %c0_i32, %c0_i32_0 : i32, i32, i32, i32
  }
}

</mosaic_0001>

<bundles_post_ra>
// kernel: tpu_custom_call.1
= control target key start
LH: loop header
LB: loop body
LE: loop exit
PB: predicated region body
PF: predicated region fallthrough
CT: control target
= control target key end

     0   :  { %8 = vsyncpa [#allocation4], 0  ;;  %s312_s12 = smov [#allocation3]   ;;  %s375_s0 = inlined_call_operand.hbm [shape: f32[2,4,256], index: 0, kind: input, shape index: {}]   ;;  %s376_s1 = inlined_call_operand.vmem [shape: f32[4,4], index: 1, kind: input, shape index: {}]   ;;  %s377_s2 = inlined_call_operand.vmem [shape: f32[4,1], index: 2, kind: input, shape index: {}]   ;;  %s378_s3 = inlined_call_operand.vmem [shape: f32[1,2,4,1], index: 3, kind: output, shape index: {}]  }
   0x1   :  { %s14_s13 = sshll.u32 %s312_s12, 4  ;;  %s288_s16 = scalar_lea.hbm %s375_s0, 256  ;;  %s15_s13 = int_to_ptr.vmem [resolvable:$true] %s14_s13 }
   0x2   :  { %p289_p0 = scmp.ne.s32.totalorder %s375_s0, %s288_s16  ;;  %p292_p1 = scmp.lt.u32.totalorder %s288_s16, %s375_s0 }
   0x4   :  { %p294_p2 = pnand %p292_p1, %p289_p0 }
   0x6   :  { %297 = shalt.err (!%p294_p2)
}
   0x7   :  { %s298_s21 = scalar_lea.vmem %s15_s13, 256  ;;  %p303_p4 = scmp.lt.s32.totalorder %s15_s13, %s15_s13 }
   0x8   :  { %p299_p3 = scmp.ne.s32.totalorder %s15_s13, %s298_s21  ;;  %p304_p5 = scmp.lt.s32.totalorder %s298_s21, %s298_s21 }
   0xa   :  { %p305_p6 = por %p304_p5, %p303_p4 }
   0xc   :  { %p306_p7 = pnand %p305_p6, %p299_p3 }
   0xe   :  { %309 = shalt.err (!%p306_p7)
}
   0xf   :  { %s313_s22 = smov 128   ;;  %s314_s23 = smov 8  }
  0x10   :  { %20 = dma.hbm_to_vmem [thread:$0]  %s375_s0, 256, %s15_s13, [#allocation4], %s313_s22, %s313_s22, %s314_s23  }
  0x11   :  { %310 = dma.done.wait [#allocation4], 256  }
  0x12   :  { %311 = vsyncadd [#allocation4], 4294967040  ;;  %vm32_vm0 = vcmask 3072   ;;  %v315_v0 = vmov 0.0   ;;  %v316_v1 = vmov 0   ;;  %v37_v2 = vld [vmem:[#allocation3] sm:$0xff] }
  0x13   :  { %33 = vst.msk [vmem:[#allocation2] sm:$0xf] %vm32_vm0, %v315_v0  ;;  %34 = vst.msk [vmem:[#allocation2 + $0x4] sm:$0xf] %vm32_vm0, %v315_v0  ;;  %118 = vmatprep.mubr.f32.mxu0 %v315_v0  ;;  %222 = vmatprep.mubr.f32.mxu1 %v315_v0  ;;  %vm49_vm1 = vcmask 1043456   ;;  %v151_v3 = vld [vmem:[#allocation3 + $0x8] sm:$0xff]  ;;  %v44_v4 = vcombine.high %v37_v2, %v37_v2 }
  0x14   :  { %277 = vset.pattern.permute.xlu0 %v316_v1  ;;  %v153_v5 = vcombine.high %v151_v3, %v151_v3  ;;  %v36_v6 = vld [vmem:[%s377_s2] sm:$0xf]  ;;  %vm45_vm2 = vcmask 31744  }
  0x15   :  { %v35_v7 = vld [vmem:[%s376_s1] sm:$0xf]  ;;  %40 = vperm.xlu0 %277, %v36_v6   ;;  %266 = vmatprep.subr.msk.mxu0 %vm49_vm1, %v44_v4 }
  0x16   :  { %269 = vmatprep.subr.msk.mxu1 %vm49_vm1, %v153_v5  ;;  %267 = vmatpush1.msk.msra.mxu0 %vm49_vm1, %v37_v2 }
  0x17   :  { %270 = vmatpush1.msk.msra.mxu1 %vm49_vm1, %v151_v3  ;;  %268 = vmatmul.mubr.msk.f32.vlgmr.msra.gmra.mrb[0].mxu0 %vm45_vm2, %v35_v7 }
  0x18   :  { %271 = vmatmul.mubr.msk.f32.vlgmr.msra.gmra.mrb[0].mxu1 %vm45_vm2, %v35_v7 }
  0x1a   :  { %v138_v45 = vld [vmem:[#allocation2] sm:$0xf]  ;;  %v243_v46 = vld [vmem:[#allocation2 + $0x4] sm:$0xf] }
  0x94   :  { %v41_v8 = vpop.permute.xlu0 %40 }
  0xea   :  { %v120_v9 = vpop.f32.mrb[0].mxu0 }
  0xeb   :  { %v224_v10 = vpop.f32.mrb[0].mxu1  ;;  %v121_v11 = vadd.f32 %v120_v9, %v41_v8  ;;  %v122_v13 = vpop.f32.mrb[1].mxu0 }
  0xec   :  { %v225_v12 = vadd.f32 %v224_v10, %v41_v8  ;;  %v226_v14 = vpop.f32.mrb[1].mxu1  ;;  %v123_v15 = vadd.f32 %v122_v13, %v41_v8 }
  0xed   :  { %v227_v16 = vadd.f32 %v226_v14, %v41_v8  ;;  %v125_v17 = vmul.f32 0.5, %v121_v11 }
  0xee   :  { %v229_v18 = vmul.f32 0.5, %v225_v12  ;;  %v126_v19 = vmul.f32 0.5, %v123_v15 }
  0xef   :  { %v230_v20 = vmul.f32 0.5, %v227_v16  ;;  %280 = vtanh.f32 %v125_v17 }
  0xf0   :  { %282 = vtanh.f32 %v229_v18 }
  0xf1   :  { %284 = vtanh.f32 %v126_v19 }
  0xf2   :  { %286 = vtanh.f32 %v230_v20 }
  0xf9   :  { %v281_v21 = vpop.eup %280 }
  0xfa   :  { %v283_v22 = vpop.eup %282  ;;  %v129_v23 = vmul.f32 0.5, %v281_v21 }
  0xfb   :  { %v285_v24 = vpop.eup %284  ;;  %v233_v25 = vmul.f32 0.5, %v283_v22 }
  0xfc   :  { %v287_v26 = vpop.eup %286  ;;  %v131_v27 = vadd.f32 0.5, %v129_v23  ;;  %v130_v28 = vmul.f32 0.5, %v285_v24 }
  0xfd   :  { %v235_v29 = vadd.f32 0.5, %v233_v25  ;;  %v234_v30 = vmul.f32 0.5, %v287_v26 }
  0xfe   :  { %v132_v31 = vadd.f32 0.5, %v130_v28 }
  0xff   :  { %v236_v32 = vadd.f32 0.5, %v234_v30 }
 0x100   :  { %v135_v33 = vcombine.low %v131_v27, %v132_v31 }
 0x101   :  { %v239_v34 = vcombine.low %v235_v29, %v236_v32 }
 0x102   :  { %v137_v35 = vmul.f32 %v135_v33, %v37_v2 }
 0x103   :  { %v241_v36 = vmul.f32 %v239_v34, %v151_v3 }
 0x104   :  { %v140_v37 = vcombine.high %v137_v35, %v137_v35  ;;  %v142_v39 = vsel %vm49_vm1, %v137_v35, 0.0 }
 0x105   :  { %v245_v38 = vcombine.high %v241_v36, %v241_v36  ;;  %v247_v41 = vsel %vm49_vm1, %v241_v36, 0.0 }
 0x106   :  { %v143_v40 = vsel %vm49_vm1, %v140_v37, 0.0 }
 0x107   :  { %v248_v42 = vsel %vm49_vm1, %v245_v38, 0.0  ;;  %v144_v43 = vadd.f32 %v143_v40, %v142_v39 }
 0x108   :  { %v249_v44 = vadd.f32 %v248_v42, %v247_v41 }
 0x109   :  { %145 = vadd.xlane.f32.xlu0 %v144_v43 }
 0x10a   :  { %250 = vadd.xlane.f32.xlu1 %v249_v44 }
 0x196   :  { %v146_v47 = vpop.xlane.xlu0 %145 }
 0x197   :  { %v251_v48 = vpop.xlane.xlu1 %250  ;;  %v147_v49 = vadd.f32 %v146_v47, %v138_v45 }
 0x198   :  { %v252_v50 = vadd.f32 %v251_v48, %v243_v46 }
 0x199   :  { %149 = vst.msk [vmem:[#allocation2] sm:$0xf] %vm32_vm0, %v147_v49 }
 0x19a   :  { %253 = vst.msk [vmem:[#allocation2 + $0x4] sm:$0xf] %vm32_vm0, %v252_v50 }
 0x1a0   :  { %v257_v51 = vld [vmem:[#allocation2] sm:$0xf] }
 0x1a1   :  { %v258_v52 = vld [vmem:[#allocation2 + $0x4] sm:$0xf]  ;;  %259 = vst.msk [vmem:[%s378_s3] sm:$0xf] %vm32_vm0, %v257_v51 }
 0x1a2   :  { %260 = vst.msk [vmem:[%s378_s3 + $0x4] sm:$0xf] %vm32_vm0, %v258_v52 }
 0x1a3   :  { %265 = vsyncpa [#allocation4], 1 }

</bundles_post_ra>
